<compile_context>
chip_gen: v5e
topology: v5e:2x2
jax: 0.10.0
libtpu: 0.0.40
codegen_flags: <defaults>
</compile_context>

<pallas_src>
import functools

import jax
import jax.numpy as jnp
from jax.experimental import pallas as pl
from jax.experimental.pallas import tpu as pltpu


def _round_up(x, m):
    return ((x + m - 1) // m) * m


def _pick_tile_rows(n, c, dtype_bytes, vmem_tile_budget_bytes=12 * 1024 * 1024):
    """Largest row tile (multiple of 8) such that the 2 logits streams x
    double-buffering fit the VMEM budget; clamped to the (padded) batch."""
    per_row_bytes = 4 * c * dtype_bytes            # 2 streams x 2 buffers
    tm = vmem_tile_budget_bytes // max(per_row_bytes, 1)
    tm = max(8, min(512, (tm // 8) * 8))
    n_pad = _round_up(max(n, 1), 8)
    return min(tm, n_pad)


def _ce_tile_sum(logits, labels, row_start, n_total):
    """Sum over valid rows of this tile of (logsumexp(x) - x[label]).

    Works in shifted space (row_max cancels algebraically), upcasts the tile
    to f32 after the load (so bf16 HBM storage halves DMA bytes), and masks
    padded rows of the last partial tile.  Returns a (1, 1) f32 array.
    """
    tm, c = logits.shape
    x = logits.astype(jnp.float32)
    col = jax.lax.broadcasted_iota(jnp.int32, (tm, c), 1)
    row_max = jnp.max(x, axis=-1, keepdims=True)
    shifted = x - row_max
    lse = jnp.log(jnp.sum(jnp.exp(shifted), axis=-1, keepdims=True))
    picked = jnp.sum(jnp.where(col == labels, shifted, 0.0),
                     axis=-1, keepdims=True)
    loss_rows = lse - picked                                   # (tm, 1)
    row_ids = jax.lax.broadcasted_iota(jnp.int32, (tm, 1), 0) + row_start
    loss_rows = jnp.where(row_ids < n_total, loss_rows, 0.0)
    return jnp.sum(loss_rows, keepdims=True)                   # (1, 1)


def _distill_hard_kernel(cls_logits_ref, cls_labels_ref,
                         dist_logits_ref, dist_labels_ref,
                         base_ref, total_ref,
                         acc_cls_ref, acc_dist_ref,
                         *, alpha, n_total, tile_rows):
    i = pl.program_id(0)

    @pl.when(i == 0)
    def _init():
        acc_cls_ref[...] = jnp.zeros_like(acc_cls_ref)
        acc_dist_ref[...] = jnp.zeros_like(acc_dist_ref)

    row_start = i * tile_rows
    acc_cls_ref[...] += _ce_tile_sum(cls_logits_ref[...], cls_labels_ref[...],
                                     row_start, n_total)
    acc_dist_ref[...] += _ce_tile_sum(dist_logits_ref[...], dist_labels_ref[...],
                                      row_start, n_total)

    @pl.when(i == pl.num_programs(0) - 1)
    def _finalize():
        inv_n = 1.0 / float(n_total)                 # divide once at the end
        base = acc_cls_ref[...] * inv_n
        dist = acc_dist_ref[...] * inv_n
        base_ref[...] = base
        total_ref[...] = (1.0 - alpha) * base + alpha * dist


class DistillationLoss:
    """JAX/Pallas port of modeling/distillation_loss.py::DistillationLoss."""

    def __init__(self, alpha: float = 0.5, loss_type: str = "hard"):
        if loss_type not in ("hard", "soft"):
            raise ValueError(
                "Distillation type not supported: {}".format(loss_type))
        self._loss_type = loss_type
        self.alpha = float(alpha)

    def __call__(self, classification_output, classification_labels,
                 distillation_output, distillation_labels, tile_rows=None):
        if self._loss_type == "soft":
            # TODO(synk): 'soft' branch is `pass` in the reference module.
            raise NotImplementedError(
                "soft distillation not specified in reference")

        n, c = classification_output.shape
        cls_labels = classification_labels.astype(jnp.int32).reshape(n, 1)
        dist_labels = distillation_labels.astype(jnp.int32).reshape(n, 1)

        dtype_bytes = jnp.dtype(classification_output.dtype).itemsize
        if tile_rows is None:
            tm = _pick_tile_rows(n, c, dtype_bytes)
        else:
            tm = max(8, _round_up(int(tile_rows), 8))
        num_tiles = pl.cdiv(n, tm)

        kernel = functools.partial(_distill_hard_kernel, alpha=self.alpha,
                                   n_total=n, tile_rows=tm)

        cost = pl.CostEstimate(
            flops=12 * n * c,                 # max/sub/exp-sum/log/pick x2 streams
            transcendentals=2 * n * c,        # exp on both streams
            bytes_accessed=2 * n * c * dtype_bytes + 2 * n * 4 + 8,
        )

        base, total = pl.pallas_call(
            kernel,
            out_shape=(
                jax.ShapeDtypeStruct((1, 1), jnp.float32),
                jax.ShapeDtypeStruct((1, 1), jnp.float32),
            ),
            grid=(num_tiles,),
            in_specs=[
                pl.BlockSpec((tm, c), lambda i: (i, 0)),   # cls logits tile
                pl.BlockSpec((tm, 1), lambda i: (i, 0)),   # cls labels tile
                pl.BlockSpec((tm, c), lambda i: (i, 0)),   # dist logits tile
                pl.BlockSpec((tm, 1), lambda i: (i, 0)),   # dist labels tile
            ],
            out_specs=(
                pl.BlockSpec((1, 1), lambda i: (0, 0)),    # base loss
                pl.BlockSpec((1, 1), lambda i: (0, 0)),    # blended loss
            ),
            scratch_shapes=[
                pltpu.VMEM((1, 1), jnp.float32),           # running cls CE sum
                pltpu.VMEM((1, 1), jnp.float32),           # running dist CE sum
            ],
            compiler_params=pltpu.CompilerParams(
                dimension_semantics=("arbitrary",),        # reduction axis
                vmem_limit_bytes=32 * 1024 * 1024,
            ),
            cost_estimate=cost,
        )(classification_output, cls_labels, distillation_output, dist_labels)
        return base[0, 0], total[0, 0]


if __name__ == "__main__":
    key = jax.random.PRNGKey(0)
    k1, k2, k3, k4 = jax.random.split(key, 4)

    # Small synthetic shapes: batch=30 (exercises last-tile masking),
    # num_classes=128.
    N, C = 30, 128
    cls_logits = jax.random.normal(k1, (N, C), dtype=jnp.float32)
    dist_logits = jax.random.normal(k2, (N, C), dtype=jnp.float32)
    cls_labels = jax.random.randint(k3, (N,), 0, C, dtype=jnp.int32)
    dist_labels = jax.random.randint(k4, (N,), 0, C, dtype=jnp.int32)

    loss_fn = DistillationLoss(alpha=0.5, loss_type="hard")

    # Pure-JAX reference cross entropy.
    def ref_ce(logits, labels):
        lse = jax.nn.logsumexp(logits.astype(jnp.float32), axis=-1)
        picked = jnp.take_along_axis(
            logits.astype(jnp.float32), labels[:, None], axis=-1)[:, 0]
        return jnp.mean(lse - picked)

    ref_base = ref_ce(cls_logits, cls_labels)
    ref_total = 0.5 * ref_base + 0.5 * ref_ce(dist_logits, dist_labels)

    # 1) Auto tile size (single tile at this size -- low-overhead path).
    base_auto, total_auto = loss_fn(cls_logits, cls_labels,
                                    dist_logits, dist_labels)
    jax.block_until_ready((base_auto, total_auto))
    assert jnp.allclose(base_auto, ref_base, atol=1e-4, rtol=1e-4)
    assert jnp.allclose(total_auto, ref_total, atol=1e-4, rtol=1e-4)

    # 2) Forced small tile (grid of 2, exercises accumulation + row masking).
    base_tiled, total_tiled = loss_fn(cls_logits, cls_labels,
                                      dist_logits, dist_labels, tile_rows=16)
    jax.block_until_ready((base_tiled, total_tiled))
    assert jnp.allclose(base_tiled, ref_base, atol=1e-4, rtol=1e-4)
    assert jnp.allclose(total_tiled, ref_total, atol=1e-4, rtol=1e-4)

    print("KERNEL_OK")
</pallas_src>

<mosaic_0001>
module attributes {stable_mosaic.version = 11 : i64} {
  func.func @_distill_hard_kernel(%arg0: i32, %arg1: memref<32x128xf32, #tpu.memory_space<vmem>>, %arg2: memref<32x1xi32, #tpu.memory_space<vmem>>, %arg3: memref<32x128xf32, #tpu.memory_space<vmem>>, %arg4: memref<32x1xi32, #tpu.memory_space<vmem>>, %arg5: memref<1x1xf32, #tpu.memory_space<vmem>>, %arg6: memref<1x1xf32, #tpu.memory_space<vmem>>, %arg7: memref<1x1xf32, #tpu.memory_space<vmem>>, %arg8: memref<1x1xf32, #tpu.memory_space<vmem>>) attributes {dimension_semantics = [#tpu.dimension_semantics<arbitrary>], iteration_bounds = array<i64: 1>, scalar_prefetch = 0 : i64, scratch_operands = 2 : i64, tpu.core_type = #tpu.core_type<tc>, window_params = [{transform_indices = @transform_0, window_bounds = array<i64: 32, 128>}, {transform_indices = @transform_1, window_bounds = array<i64: 32, 1>}, {transform_indices = @transform_2, window_bounds = array<i64: 32, 128>}, {transform_indices = @transform_3, window_bounds = array<i64: 32, 1>}, {pipeline_mode = #tpu.pipeline_mode<synchronous>, transform_indices = @transform_4, window_bounds = array<i64: 1, 1>}, {pipeline_mode = #tpu.pipeline_mode<synchronous>, transform_indices = @transform_5, window_bounds = array<i64: 1, 1>}]} {
    %c0_i32 = arith.constant 0 : i32
    %0 = arith.cmpi eq, %arg0, %c0_i32 : i32
    %1 = arith.extui %0 : i1 to i32
    %c0_i32_0 = arith.constant 0 : i32
    %2 = arith.cmpi ne, %1, %c0_i32_0 : i32
    scf.if %2 {
      %cst_30 = arith.constant 0.000000e+00 : f32
      %73 = vector.broadcast %cst_30 : f32 to vector<1x1xf32>
      %c0_31 = arith.constant 0 : index
      %c0_32 = arith.constant 0 : index
      %74 = vector.load %arg7[%c0_31, %c0_32] : memref<1x1xf32, #tpu.memory_space<vmem>>, vector<1x1xf32>
      tpu.vector_store %arg7[%c0_31, %c0_32], %73 {strides = array<i32>} : memref<1x1xf32, #tpu.memory_space<vmem>>, vector<1x1xf32>,
      %cst_33 = arith.constant 0.000000e+00 : f32
      %75 = vector.broadcast %cst_33 : f32 to vector<1x1xf32>
      %c0_34 = arith.constant 0 : index
      %c0_35 = arith.constant 0 : index
      %76 = vector.load %arg8[%c0_34, %c0_35] : memref<1x1xf32, #tpu.memory_space<vmem>>, vector<1x1xf32>
      tpu.vector_store %arg8[%c0_34, %c0_35], %75 {strides = array<i32>} : memref<1x1xf32, #tpu.memory_space<vmem>>, vector<1x1xf32>,
    } else {
    }
    %c32_i32 = arith.constant 32 : i32
    %3 = arith.muli %arg0, %c32_i32 : i32
    %c0 = arith.constant 0 : index
    %c0_1 = arith.constant 0 : index
    %4 = vector.load %arg7[%c0, %c0_1] : memref<1x1xf32, #tpu.memory_space<vmem>>, vector<1x1xf32>
    %c0_2 = arith.constant 0 : index
    %c0_3 = arith.constant 0 : index
    %5 = vector.load %arg1[%c0_2, %c0_3] : memref<32x128xf32, #tpu.memory_space<vmem>>, vector<32x128xf32>
    %c0_4 = arith.constant 0 : index
    %c0_5 = arith.constant 0 : index
    %6 = vector.load %arg2[%c0_4, %c0_5] : memref<32x1xi32, #tpu.memory_space<vmem>>, vector<32x1xi32>
    %7 = tpu.iota {dimensions = array<i32: 1>} : vector<32x128xi32>
    %cst = arith.constant dense<0xFF800000> : vector<32xf32>
    %8 = vector.multi_reduction <maximumf>, %5, %cst [1] : vector<32x128xf32> to vector<32xf32>
    %9 = vector.shape_cast %8 : vector<32xf32> to vector<32x1xf32>
    %10 = vector.broadcast %9 : vector<32x1xf32> to vector<32x128xf32>
    %11 = arith.subf %5, %10 : vector<32x128xf32>
    %12 = math.exp %11 : vector<32x128xf32>
    %cst_6 = arith.constant dense<0.000000e+00> : vector<32xf32>
    %13 = vector.multi_reduction <add>, %12, %cst_6 [1] : vector<32x128xf32> to vector<32xf32>
    %14 = vector.shape_cast %13 : vector<32xf32> to vector<32x1xf32>
    %15 = math.log %14 : vector<32x1xf32>
    %16 = vector.broadcast %6 : vector<32x1xi32> to vector<32x128xi32>
    %17 = arith.cmpi eq, %7, %16 : vector<32x128xi32>
    %cst_7 = arith.constant 0.000000e+00 : f32
    %18 = vector.broadcast %cst_7 : f32 to vector<32x128xf32>
    %19 = arith.select %17, %11, %18 : vector<32x128xi1>, vector<32x128xf32>
    %cst_8 = arith.constant dense<0.000000e+00> : vector<32xf32>
    %20 = vector.multi_reduction <add>, %19, %cst_8 [1] : vector<32x128xf32> to vector<32xf32>
    %21 = vector.shape_cast %20 : vector<32xf32> to vector<32x1xf32>
    %22 = arith.subf %15, %21 : vector<32x1xf32>
    %23 = tpu.iota {dimensions = array<i32: 0>} : vector<32x1xi32>
    %24 = vector.broadcast %3 : i32 to vector<32x1xi32>
    %25 = arith.addi %23, %24 : vector<32x1xi32>
    %c30_i32 = arith.constant 30 : i32
    %26 = vector.broadcast %c30_i32 : i32 to vector<32x1xi32>
    %27 = arith.cmpi slt, %25, %26 : vector<32x1xi32>
    %cst_9 = arith.constant 0.000000e+00 : f32
    %28 = vector.broadcast %cst_9 : f32 to vector<32x1xf32>
    %29 = arith.select %27, %22, %28 : vector<32x1xi1>, vector<32x1xf32>
    %30 = vector.shape_cast %29 : vector<32x1xf32> to vector<1x32x1xf32>
    %cst_10 = arith.constant dense<0.000000e+00> : vector<1xf32>
    %31 = vector.multi_reduction <add>, %30, %cst_10 [1, 2] : vector<1x32x1xf32> to vector<1xf32>
    %32 = vector.shape_cast %31 : vector<1xf32> to vector<1x1x1xf32>
    %33 = vector.extract %32[0, 0, 0] : f32 from vector<1x1x1xf32>
    %34 = vector.broadcast %33 : f32 to vector<1x1xf32>
    %35 = arith.addf %4, %34 : vector<1x1xf32>
    %c0_11 = arith.constant 0 : index
    %c0_12 = arith.constant 0 : index
    %36 = vector.load %arg7[%c0_11, %c0_12] : memref<1x1xf32, #tpu.memory_space<vmem>>, vector<1x1xf32>
    tpu.vector_store %arg7[%c0_11, %c0_12], %35 {strides = array<i32>} : memref<1x1xf32, #tpu.memory_space<vmem>>, vector<1x1xf32>,
    %c0_13 = arith.constant 0 : index
    %c0_14 = arith.constant 0 : index
    %37 = vector.load %arg8[%c0_13, %c0_14] : memref<1x1xf32, #tpu.memory_space<vmem>>, vector<1x1xf32>
    %c0_15 = arith.constant 0 : index
    %c0_16 = arith.constant 0 : index
    %38 = vector.load %arg3[%c0_15, %c0_16] : memref<32x128xf32, #tpu.memory_space<vmem>>, vector<32x128xf32>
    %c0_17 = arith.constant 0 : index
    %c0_18 = arith.constant 0 : index
    %39 = vector.load %arg4[%c0_17, %c0_18] : memref<32x1xi32, #tpu.memory_space<vmem>>, vector<32x1xi32>
    %40 = tpu.iota {dimensions = array<i32: 1>} : vector<32x128xi32>
    %cst_19 = arith.constant dense<0xFF800000> : vector<32xf32>
    %41 = vector.multi_reduction <maximumf>, %38, %cst_19 [1] : vector<32x128xf32> to vector<32xf32>
    %42 = vector.shape_cast %41 : vector<32xf32> to vector<32x1xf32>
    %43 = vector.broadcast %42 : vector<32x1xf32> to vector<32x128xf32>
    %44 = arith.subf %38, %43 : vector<32x128xf32>
    %45 = math.exp %44 : vector<32x128xf32>
    %cst_20 = arith.constant dense<0.000000e+00> : vector<32xf32>
    %46 = vector.multi_reduction <add>, %45, %cst_20 [1] : vector<32x128xf32> to vector<32xf32>
    %47 = vector.shape_cast %46 : vector<32xf32> to vector<32x1xf32>
    %48 = math.log %47 : vector<32x1xf32>
    %49 = vector.broadcast %39 : vector<32x1xi32> to vector<32x128xi32>
    %50 = arith.cmpi eq, %40, %49 : vector<32x128xi32>
    %cst_21 = arith.constant 0.000000e+00 : f32
    %51 = vector.broadcast %cst_21 : f32 to vector<32x128xf32>
    %52 = arith.select %50, %44, %51 : vector<32x128xi1>, vector<32x128xf32>
    %cst_22 = arith.constant dense<0.000000e+00> : vector<32xf32>
    %53 = vector.multi_reduction <add>, %52, %cst_22 [1] : vector<32x128xf32> to vector<32xf32>
    %54 = vector.shape_cast %53 : vector<32xf32> to vector<32x1xf32>
    %55 = arith.subf %48, %54 : vector<32x1xf32>
    %56 = tpu.iota {dimensions = array<i32: 0>} : vector<32x1xi32>
    %57 = vector.broadcast %3 : i32 to vector<32x1xi32>
    %58 = arith.addi %56, %57 : vector<32x1xi32>
    %c30_i32_23 = arith.constant 30 : i32
    %59 = vector.broadcast %c30_i32_23 : i32 to vector<32x1xi32>
    %60 = arith.cmpi slt, %58, %59 : vector<32x1xi32>
    %cst_24 = arith.constant 0.000000e+00 : f32
    %61 = vector.broadcast %cst_24 : f32 to vector<32x1xf32>
    %62 = arith.select %60, %55, %61 : vector<32x1xi1>, vector<32x1xf32>
    %63 = vector.shape_cast %62 : vector<32x1xf32> to vector<1x32x1xf32>
    %cst_25 = arith.constant dense<0.000000e+00> : vector<1xf32>
    %64 = vector.multi_reduction <add>, %63, %cst_25 [1, 2] : vector<1x32x1xf32> to vector<1xf32>
    %65 = vector.shape_cast %64 : vector<1xf32> to vector<1x1x1xf32>
    %66 = vector.extract %65[0, 0, 0] : f32 from vector<1x1x1xf32>
    %67 = vector.broadcast %66 : f32 to vector<1x1xf32>
    %68 = arith.addf %37, %67 : vector<1x1xf32>
    %c0_26 = arith.constant 0 : index
    %c0_27 = arith.constant 0 : index
    %69 = vector.load %arg8[%c0_26, %c0_27] : memref<1x1xf32, #tpu.memory_space<vmem>>, vector<1x1xf32>
    tpu.vector_store %arg8[%c0_26, %c0_27], %68 {strides = array<i32>} : memref<1x1xf32, #tpu.memory_space<vmem>>, vector<1x1xf32>,
    %c0_i32_28 = arith.constant 0 : i32
    %70 = arith.cmpi eq, %arg0, %c0_i32_28 : i32
    %71 = arith.extui %70 : i1 to i32
    %c0_i32_29 = arith.constant 0 : i32
    %72 = arith.cmpi ne, %71, %c0_i32_29 : i32
    scf.if %72 {
      %c0_30 = arith.constant 0 : index
      %c0_31 = arith.constant 0 : index
      %73 = vector.load %arg7[%c0_30, %c0_31] : memref<1x1xf32, #tpu.memory_space<vmem>>, vector<1x1xf32>
      %cst_32 = arith.constant 0.0333333351 : f32
      %74 = vector.broadcast %cst_32 : f32 to vector<1x1xf32>
      %75 = arith.mulf %73, %74 : vector<1x1xf32>
      %c0_33 = arith.constant 0 : index
      %c0_34 = arith.constant 0 : index
      %76 = vector.load %arg8[%c0_33, %c0_34] : memref<1x1xf32, #tpu.memory_space<vmem>>, vector<1x1xf32>
      %cst_35 = arith.constant 0.0333333351 : f32
      %77 = vector.broadcast %cst_35 : f32 to vector<1x1xf32>
      %78 = arith.mulf %76, %77 : vector<1x1xf32>
      %c0_36 = arith.constant 0 : index
      %c0_37 = arith.constant 0 : index
      %79 = vector.load %arg5[%c0_36, %c0_37] : memref<1x1xf32, #tpu.memory_space<vmem>>, vector<1x1xf32>
      tpu.vector_store %arg5[%c0_36, %c0_37], %75 {strides = array<i32>} : memref<1x1xf32, #tpu.memory_space<vmem>>, vector<1x1xf32>,
      %cst_38 = arith.constant 5.000000e-01 : f32
      %80 = vector.broadcast %cst_38 : f32 to vector<1x1xf32>
      %81 = arith.mulf %80, %75 : vector<1x1xf32>
      %cst_39 = arith.constant 5.000000e-01 : f32
      %82 = vector.broadcast %cst_39 : f32 to vector<1x1xf32>
      %83 = arith.mulf %82, %78 : vector<1x1xf32>
      %84 = arith.addf %81, %83 : vector<1x1xf32>
      %c0_40 = arith.constant 0 : index
      %c0_41 = arith.constant 0 : index
      %85 = vector.load %arg6[%c0_40, %c0_41] : memref<1x1xf32, #tpu.memory_space<vmem>>, vector<1x1xf32>
      tpu.vector_store %arg6[%c0_40, %c0_41], %84 {strides = array<i32>} : memref<1x1xf32, #tpu.memory_space<vmem>>, vector<1x1xf32>,
    } else {
    }
    return
  }
  func.func @transform_0(%arg0: i32) -> (i32, i32) {
    %c0_i32 = arith.constant 0 : i32
    %c0_i32_0 = arith.constant 0 : i32
    return %arg0, %c0_i32 : i32, i32
  }
  func.func @transform_1(%arg0: i32) -> (i32, i32) {
    %c0_i32 = arith.constant 0 : i32
    %c0_i32_0 = arith.constant 0 : i32
    return %arg0, %c0_i32 : i32, i32
  }
  func.func @transform_2(%arg0: i32) -> (i32, i32) {
    %c0_i32 = arith.constant 0 : i32
    %c0_i32_0 = arith.constant 0 : i32
    return %arg0, %c0_i32 : i32, i32
  }
  func.func @transform_3(%arg0: i32) -> (i32, i32) {
    %c0_i32 = arith.constant 0 : i32
    %c0_i32_0 = arith.constant 0 : i32
    return %arg0, %c0_i32 : i32, i32
  }
  func.func @transform_4(%arg0: i32) -> (i32, i32) {
    %c0_i32 = arith.constant 0 : i32
    %c0_i32_0 = arith.constant 0 : i32
    %c0_i32_1 = arith.constant 0 : i32
    return %c0_i32, %c0_i32_0 : i32, i32
  }
  func.func @transform_5(%arg0: i32) -> (i32, i32) {
    %c0_i32 = arith.constant 0 : i32
    %c0_i32_0 = arith.constant 0 : i32
    %c0_i32_1 = arith.constant 0 : i32
    return %c0_i32, %c0_i32_0 : i32, i32
  }
}

</mosaic_0001>

<bundles_post_ra>
// kernel: tpu_custom_call.1
= control target key start
LH: loop header
LB: loop body
LE: loop exit
PB: predicated region body
PF: predicated region fallthrough
CT: control target
= control target key end

     0   :  { %11 = vsyncpa [#allocation5], 0  ;;  %v386_v3 = vmov 0   ;;  %s518_s0 = inlined_call_operand.vmem [shape: f32[30,128], index: 0, kind: input, shape index: {}]   ;;  %s519_s1 = inlined_call_operand.vmem [shape: s32[30,1], index: 1, kind: input, shape index: {}]   ;;  %s520_s2 = inlined_call_operand.vmem [shape: f32[30,128], index: 2, kind: input, shape index: {}]   ;;  %s521_s3 = inlined_call_operand.vmem [shape: s32[30,1], index: 3, kind: input, shape index: {}]   ;;  %s522_s4 = inlined_call_operand.hbm [shape: f32[1,1], index: 4, kind: output, shape index: {0}]   ;;  %s523_s5 = inlined_call_operand.hbm [shape: f32[1,1], index: 5, kind: output, shape index: {1}]  }
   0x1   :  { %v148_v0 = vld [vmem:[%s520_s2] sm:$0xff]  ;;  %v426_v1 = vld [vmem:[%s518_s0 + $0x10] sm:$0xff]  ;;  %301 = vset.pattern.permute.xlu1 %v386_v3  ;;  %300 = vset.pattern.permute.xlu0 %v386_v3 }
   0x2   :  { %v30_v2 = vld [vmem:[%s518_s0] sm:$0xff]  ;;  %156 = vmax.xlane.f32.xlu1 %v148_v0  ;;  %44 = vmax.xlane.f32.xlu2 %v426_v1 }
   0x3   :  { %40 = vmax.xlane.f32.xlu0 %v30_v2  ;;  %299 = vset.pattern.permute.xlu2 %v386_v3 }
   0x4   :  { %12 = vsyncpa [#allocation7], 0  ;;  %v149_v4 = vld [vmem:[%s520_s2 + $0x8] sm:$0xff]  ;;  %v150_v5 = vld [vmem:[%s520_s2 + $0x10] sm:$0xff]  ;;  %v38_v21 = vlaneseq  ;;  %vm126_vm8 = vcmask 7168   ;;  %vm25_vm10 = vcmask 0  }
   0x5   :  { %v31_v6 = vld [vmem:[%s518_s0 + $0x8] sm:$0xff]  ;;  %v444_v7 = vld [vmem:[%s520_s2 + $0x18] sm:$0xff]  ;;  %v34_v9 = vld [vmem:[%s519_s1] sm:$0xff]  ;;  %s388_s23 = smov [#allocation4]   ;;  %s266_s27 = sshll.u32 %s522_s4, 4  ;;  %s267_s27 = int_to_ptr.hbm [resolvable:$true] %s266_s27 }
   0x6   :  { %v449_v8 = vld [vmem:[%s518_s0 + $0x18] sm:$0xff]  ;;  %v35_v10 = vld [vmem:[%s519_s1 + $0x8] sm:$0xff]  ;;  %v152_v12 = vld [vmem:[%s521_s3] sm:$0xff]  ;;  %v478_v23 = vand.u32 127, %v38_v21  ;;  %s264_s24 = sshll.u32 %s388_s23, 4  ;;  %s389_s28 = smov [#allocation6]   ;;  %s265_s24 = int_to_ptr.vmem [resolvable:$true] %s264_s24 }
   0x7   :  { %v153_v11 = vld [vmem:[%s521_s3 + $0x8] sm:$0xff]  ;;  %v36_v13 = vld [vmem:[%s519_s1 + $0x10] sm:$0xff]  ;;  %v37_v15 = vld [vmem:[%s519_s1 + $0x18] sm:$0xff]  ;;  %s275_s29 = sshll.u32 %s389_s28, 4  ;;  %s277_s7 = sshll.u32 %s523_s5, 4  ;;  %s276_s29 = int_to_ptr.vmem [resolvable:$true] %s275_s29  ;;  %s278_s7 = int_to_ptr.hbm [resolvable:$true] %s277_s7 }
   0x8   :  { %v154_v14 = vld [vmem:[%s521_s3 + $0x10] sm:$0xff]  ;;  %v155_v16 = vld [vmem:[%s521_s3 + $0x18] sm:$0xff] }
   0xa   :  { %158 = vmax.xlane.f32.xlu1 %v149_v4  ;;  %160 = vmax.xlane.f32.xlu2 %v150_v5 }
   0xb   :  { %42 = vmax.xlane.f32.xlu0 %v31_v6 }
  0x12   :  { %162 = vmax.xlane.f32.xlu1 %v444_v7 }
  0x13   :  { %46 = vmax.xlane.f32.xlu0 %v449_v8 }
  0x22   :  { %77 = vperm.xlu2 %299, %v34_v9  }
  0x27   :  { %80 = vperm.xlu0 %300, %v35_v10  }
  0x2a   :  { %196 = vperm.xlu2 %299, %v153_v11  }
  0x2b   :  { %193 = vperm.xlu1 %301, %v152_v12  }
  0x32   :  { %83 = vperm.xlu2 %299, %v36_v13  }
  0x33   :  { %199 = vperm.xlu1 %301, %v154_v14  }
  0x3a   :  { %86 = vperm.xlu2 %299, %v37_v15  }
  0x3b   :  { %202 = vperm.xlu1 %301, %v155_v16  }
  0x75   :  { %v45_v17 = vpop.xlane.xlu2 %44  ;;  %v157_v20 = vpop.xlane.xlu1 %156 }
  0x76   :  { %v41_v18 = vpop.xlane.xlu0 %40  ;;  %v164_v22 = vsub.f32 %v148_v0, %v157_v20  ;;  %v50_v47 = vsub.f32 %v426_v1, %v45_v17 }
  0x77   :  { %v48_v24 = vsub.f32 %v30_v2, %v41_v18  ;;  %v109_v18 = vshrl.u32 %v38_v21, 7 }
  0x78   :  { %v168_v25 = vmul.f32 1.442695, %v164_v22  ;;  %v56_v51 = vmul.f32 1.442695, %v50_v47 }
  0x79   :  { %v52_v42 = vmul.f32 1.442695, %v48_v24 }
  0x7a   :  { %302 = vpow2.f32 %v168_v25  ;;  %v112_v25 = vadd.s32 24, %v109_v18 }
  0x7c   :  { %vm121_vm9 = vcmp.lt.s32.totalorder %v112_v25, 30 }
  0x7d   :  { %v161_v19 = vpop.xlane.xlu2 %160  ;;  %v159_v31 = vpop.xlane.xlu1 %158 }
  0x7e   :  { %v481_v27 = vsub.f32 %v150_v5, %v161_v19  ;;  %v43_v28 = vpop.xlane.xlu0 %42  ;;  %v165_v43 = vsub.f32 %v149_v4, %v159_v31 }
  0x7f   :  { %v49_v36 = vsub.f32 %v31_v6, %v43_v28 }
  0x80   :  { %v172_v30 = vmul.f32 1.442695, %v481_v27  ;;  %v303_v33 = vpop.eup %302  ;;  %v170_v48 = vmul.f32 1.442695, %v165_v43 }
  0x81   :  { %v54_v39 = vmul.f32 1.442695, %v49_v36 }
  0x82   :  { %304 = vpow2.f32 %v172_v30 }
  0x83   :  { %306 = vpow2.f32 %v54_v39 }
  0x84   :  { %308 = vpow2.f32 %v52_v42 }
  0x85   :  { %v78_v26 = vpop.permute.xlu2 %77  ;;  %v163_v37 = vpop.xlane.xlu1 %162  ;;  %310 = vpow2.f32 %v170_v48 }
  0x86   :  { %vm88_vm0 = vcmp.eq.s32.totalorder %v478_v23, %v78_v26  ;;  %v47_v34 = vpop.xlane.xlu0 %46  ;;  %312 = vpow2.f32 %v56_v51  ;;  %v167_v56 = vsub.f32 %v444_v7, %v163_v37 }
  0x87   :  { %v92_v29 = vsel %vm88_vm0, %v48_v24, 0.0  ;;  %v51_v52 = vsub.f32 %v449_v8, %v47_v34 }
  0x88   :  { %96 = vadd.xlane.f32.xlu1 %v92_v29  ;;  %v305_v35 = vpop.eup %304  ;;  %v174_v58 = vmul.f32 1.442695, %v167_v56 }
  0x89   :  { %v307_v50 = vpop.eup %306  ;;  %v58_v55 = vmul.f32 1.442695, %v51_v52 }
  0x8a   :  { %v309_v53 = vpop.eup %308 }
  0x8b   :  { %v311_v57 = vpop.eup %310  ;;  %314 = vpow2.f32 %v58_v55 }
  0x8c   :  { %v313_v59 = vpop.eup %312  ;;  %316 = vpow2.f32 %v174_v58 }
  0x8d   :  { %v197_v32 = vpop.permute.xlu2 %196 }
  0x8e   :  { %vm205_vm2 = vcmp.eq.s32.totalorder %v478_v23, %v197_v32 }
  0x8f   :  { %v209_v46 = vsel %vm205_vm2, %v165_v43, 0.0 }
  0x90   :  { %176 = vadd.xlane.f32.xlu1 %v303_v33 }
  0x91   :  { %v315_v60 = vpop.eup %314 }
  0x92   :  { %v317_v62 = vpop.eup %316 }
  0x95   :  { %v84_v38 = vpop.permute.xlu2 %83 }
  0x96   :  { %vm90_vm5 = vcmp.eq.s32.totalorder %v478_v23, %v84_v38 }
  0x97   :  { %v94_v63 = vsel %vm90_vm5, %v50_v47, 0.0 }
  0x98   :  { %180 = vadd.xlane.f32.xlu1 %v305_v35 }
  0x99   :  { %v81_v40 = vpop.permute.xlu0 %80 }
  0x9a   :  { %vm89_vm1 = vcmp.eq.s32.totalorder %v478_v23, %v81_v40 }
  0x9b   :  { %v93_v41 = vsel %vm89_vm1, %v49_v36, 0.0 }
  0x9c   :  { %98 = vadd.xlane.f32.xlu2 %v93_v41 }
  0x9d   :  { %v194_v44 = vpop.permute.xlu1 %193  ;;  %v87_v49 = vpop.permute.xlu2 %86 }
  0x9e   :  { %vm204_vm3 = vcmp.eq.s32.totalorder %v478_v23, %v194_v44  ;;  %vm91_vm4 = vcmp.eq.s32.totalorder %v478_v23, %v87_v49 }
  0x9f   :  { %v208_v45 = vsel %vm204_vm3, %v164_v22, 0.0  ;;  %v95_v54 = vsel %vm91_vm4, %v51_v52, 0.0 }
  0xa0   :  { %212 = vadd.xlane.f32.xlu0 %v208_v45  ;;  %214 = vadd.xlane.f32.xlu1 %v209_v46 }
  0xa4   :  { %62 = vadd.xlane.f32.xlu2 %v307_v50 }
  0xa5   :  { %v200_v61 = vpop.permute.xlu1 %199 }
  0xa6   :  { %vm206_vm6 = vcmp.eq.s32.totalorder %v478_v23, %v200_v61  ;;  %v387_v61 = vmov 0.0  }
  0xa7   :  { %v210_v1 = vsel %vm206_vm6, %v481_v27, 0.0  ;;  %26 = vst.msk [vmem:[#allocation2] sm:$0x1] %vm25_vm10, %v387_v61 }
  0xa8   :  { %60 = vadd.xlane.f32.xlu0 %v309_v53  ;;  %102 = vadd.xlane.f32.xlu1 %v95_v54  ;;  %27 = vst.msk [vmem:[#allocation3] sm:$0x1] %vm25_vm10, %v387_v61 }
  0xac   :  { %178 = vadd.xlane.f32.xlu2 %v311_v57 }
  0xad   :  { %v203_v0 = vpop.permute.xlu1 %202 }
  0xae   :  { %vm207_vm7 = vcmp.eq.s32.totalorder %v478_v23, %v203_v0 }
  0xaf   :  { %v211_v2 = vsel %vm207_vm7, %v167_v56, 0.0 }
  0xb0   :  { %64 = vadd.xlane.f32.xlu0 %v313_v59 }
  0xb4   :  { %66 = vadd.xlane.f32.xlu2 %v315_v60 }
  0xb8   :  { %182 = vadd.xlane.f32.xlu0 %v317_v62 }
  0xbc   :  { %100 = vadd.xlane.f32.xlu2 %v94_v63 }
  0xc0   :  { %216 = vadd.xlane.f32.xlu0 %v210_v1 }
  0xc4   :  { %218 = vadd.xlane.f32.xlu2 %v211_v2 }
  0xfb   :  { %v97_v3 = vpop.xlane.xlu1 %96 }
 0x103   :  { %v177_v5 = vpop.xlane.xlu1 %176 }
 0x10b   :  { %v181_v9 = vpop.xlane.xlu1 %180 }
 0x10f   :  { %v99_v4 = vpop.xlane.xlu2 %98 }
 0x113   :  { %v213_v6 = vpop.xlane.xlu0 %212  ;;  %v215_v14 = vpop.xlane.xlu1 %214 }
 0x117   :  { %v63_v7 = vpop.xlane.xlu2 %62 }
 0x11b   :  { %v61_v8 = vpop.xlane.xlu0 %60  ;;  %v103_v34 = vpop.xlane.xlu1 %102 }
 0x11c   :  { %318 = vlog2.f32 %v61_v8 }
 0x11d   :  { %320 = vlog2.f32 %v63_v7 }
 0x11f   :  { %v179_v10 = vpop.xlane.xlu2 %178 }
 0x120   :  { %322 = vlog2.f32 %v179_v10 }
 0x122   :  { %v319_v11 = vpop.eup %318 }
 0x123   :  { %v65_v12 = vpop.xlane.xlu0 %64  ;;  %v321_v13 = vpop.eup %320  ;;  %v69_v15 = vmul.f32 0.6931472, %v319_v11 }
 0x124   :  { %324 = vlog2.f32 %v65_v12  ;;  %v71_v17 = vmul.f32 0.6931472, %v321_v13  ;;  %v29_v12 = vld [vmem:[#allocation2] sm:$0x1] }
 0x125   :  { %326 = vlog2.f32 %v177_v5  ;;  %v104_v20 = vsub.f32 %v69_v15, %v97_v3  ;;  %v147_v15 = vld [vmem:[#allocation3] sm:$0x1] }
 0x126   :  { %v323_v19 = vpop.eup %322  ;;  %v105_v24 = vsub.f32 %v71_v17, %v99_v4 }
 0x127   :  { %v67_v16 = vpop.xlane.xlu2 %66  ;;  %v187_v27 = vmul.f32 0.6931472, %v323_v19  ;;  %v127_v29 = vsel %vm126_vm8, %v104_v20, 0.0 }
 0x128   :  { %328 = vlog2.f32 %v67_v16  ;;  %v128_v21 = vsel %vm126_vm8, %v105_v24, 0.0 }
 0x129   :  { %330 = vlog2.f32 %v181_v9  ;;  %v221_v37 = vsub.f32 %v187_v27, %v215_v14  ;;  %v129_v39 = vadd.f32 %v128_v21, %v127_v29 }
 0x12a   :  { %v325_v22 = vpop.eup %324 }
 0x12b   :  { %v183_v23 = vpop.xlane.xlu0 %182  ;;  %v327_v26 = vpop.eup %326  ;;  %v73_v30 = vmul.f32 0.6931472, %v325_v22  ;;  %v229_v49 = vsel %vm126_vm8, %v221_v37, 0.0 }
 0x12c   :  { %332 = vlog2.f32 %v183_v23  ;;  %v185_v36 = vmul.f32 0.6931472, %v327_v26 }
 0x12e   :  { %v329_v28 = vpop.eup %328  ;;  %v220_v43 = vsub.f32 %v185_v36, %v213_v6 }
 0x12f   :  { %v331_v31 = vpop.eup %330  ;;  %v75_v32 = vmul.f32 0.6931472, %v329_v28  ;;  %v101_v33 = vpop.xlane.xlu2 %100 }
 0x130   :  { %v106_v35 = vsub.f32 %v73_v30, %v101_v33  ;;  %v189_v40 = vmul.f32 0.6931472, %v331_v31  ;;  %v228_v52 = vsel %vm126_vm8, %v220_v43, 0.0 }
 0x131   :  { %v107_v38 = vsub.f32 %v75_v32, %v103_v34  ;;  %v230_v56 = vadd.f32 %v229_v49, %v228_v52 }
 0x132   :  { %v130_v41 = vsel %vm126_vm8, %v106_v35, 0.0  ;;  %v333_v42 = vpop.eup %332 }
 0x133   :  { %v217_v44 = vpop.xlane.xlu0 %216  ;;  %v125_v45 = vsel %vm121_vm9, %v107_v38, 0.0  ;;  %v131_v46 = vadd.f32 %v130_v41, %v129_v39  ;;  %v191_v51 = vmul.f32 0.6931472, %v333_v42 }
 0x134   :  { %v222_v47 = vsub.f32 %v189_v40, %v217_v44  ;;  %v132_v48 = vsel %vm126_vm8, %v125_v45, 0.0 }
 0x135   :  { %v133_v50 = vadd.f32 %v132_v48, %v131_v46 }
 0x136   :  { %v231_v53 = vsel %vm126_vm8, %v222_v47, 0.0 }
 0x137   :  { %v219_v54 = vpop.xlane.xlu2 %218  ;;  %134 = vadd.xlane.f32.xlu0 %v133_v50  ;;  %v232_v58 = vadd.f32 %v231_v53, %v230_v56 }
 0x138   :  { %v223_v55 = vsub.f32 %v191_v51, %v219_v54 }
 0x13a   :  { %v227_v57 = vsel %vm121_vm9, %v223_v55, 0.0 }
 0x13b   :  { %v233_v59 = vsel %vm126_vm8, %v227_v57, 0.0 }
 0x13c   :  { %v234_v60 = vadd.f32 %v233_v59, %v232_v58 }
 0x13e   :  { %235 = vadd.xlane.f32.xlu1 %v234_v60 }
 0x1aa   :  { %v135_v62 = vpop.xlane.xlu0 %134 }
 0x1ab   :  { %v136_v63 = vrot.slane %v135_v62, 4 }
 0x1ad   :  { %v137_v0 = vadd.f32 %v136_v63, %v135_v62 }
 0x1af   :  { %v138_v1 = vrot.slane %v137_v0, 2 }
 0x1b1   :  { %v236_v2 = vpop.xlane.xlu1 %235  ;;  %v139_v3 = vadd.f32 %v138_v1, %v137_v0 }
 0x1b2   :  { %v237_v4 = vrot.slane %v236_v2, 4 }
 0x1b3   :  { %v140_v5 = vrot.slane %v139_v3, 1 }
 0x1b4   :  { %v238_v6 = vadd.f32 %v237_v4, %v236_v2 }
 0x1b5   :  { %v141_v7 = vadd.f32 %v140_v5, %v139_v3 }
 0x1b6   :  { %v239_v8 = vrot.slane %v238_v6, 2 }
 0x1b7   :  { %291 = vpush %v141_v7 }
 0x1b8   :  { %v240_v9 = vadd.f32 %v239_v8, %v238_v6 }
 0x1ba   :  { %v241_v10 = vrot.slane %v240_v9, 1 }
 0x1bc   :  { %v242_v11 = vadd.f32 %v241_v10, %v240_v9 }
 0x1be   :  { %293 = vpush %v242_v11 }
 0x1e8   :  { %s292_s1 = spop %291 }
 0x1e9   :  { %v143_v13 = vstv %s292_s1 }
 0x1ea   :  { %v144_v14 = vadd.f32 %v143_v13, %v29_v12 }
 0x1ec   :  { %146 = vst.msk [vmem:[#allocation2] sm:$0x1] %vm25_vm10, %v144_v14 }
 0x1ef   :  { %s294_s3 = spop %293 }
 0x1f0   :  { %v244_v16 = vstv %s294_s3 }
 0x1f1   :  { %v245_v17 = vadd.f32 %v244_v16, %v147_v15 }
 0x1f3   :  { %246 = vst.msk [vmem:[#allocation3] sm:$0x1] %vm25_vm10, %v245_v17  ;;  %v250_v18 = vld [vmem:[#allocation2] sm:$0x1] }
 0x1f4   :  { %v251_v19 = vmul.f32 0.033333335, %v250_v18 }
 0x1f6   :  { %254 = vst.msk [vmem:[#allocation4] sm:$0x1] %vm25_vm10, %v251_v19  ;;  %v255_v23 = vmul.f32 0.5, %v251_v19 }
 0x1f7   :  { %269 = dma.vmem_to_hbm [thread:$0]  %s265_s24, 16, %s267_s27, [#allocation5]  }
 0x1fa   :  { %v252_v20 = vld [vmem:[#allocation3] sm:$0x1] }
 0x1fb   :  { %v253_v22 = vmul.f32 0.033333335, %v252_v20 }
 0x1fd   :  { %v256_v24 = vmul.f32 0.5, %v253_v22 }
 0x1ff   :  { %v257_v25 = vadd.f32 %v256_v24, %v255_v23 }
 0x201   :  { %258 = vst.msk [vmem:[#allocation6] sm:$0x1] %vm25_vm10, %v257_v25 }
 0x202   :  { %280 = dma.vmem_to_hbm [thread:$0]  %s276_s29, 16, %s278_s7, [#allocation7]  }
 0x203   :  { %382 = dma.done.wait [#allocation5], 16  }
 0x204   :  { %383 = vsyncadd [#allocation5], 4294967280 }
 0x205   :  { %384 = dma.done.wait [#allocation7], 16  }
 0x206   :  { %385 = vsyncadd [#allocation7], 4294967280 }
 0x207   :  { %289 = vsyncpa [#allocation5], 1 }
 0x208   :  { %290 = vsyncpa [#allocation7], 1 }

</bundles_post_ra>
